<compile_context>
chip_gen: v7x
topology: tpu7x:2x2x1
jax: 0.10.0
libtpu: 0.0.40
codegen_flags: <defaults>
</compile_context>

<pallas_src>
import math

import jax
import jax.numpy as jnp
from jax.experimental import pallas as pl
from jax.experimental.pallas import tpu as pltpu

_INPUT_SIZE = 28 * 28          # 784
_OUTPUT_SIZE = 10
_OUTPUT_PAD = 128              # lane-dense output block
_DEFAULT_BLOCK_B = 512         # 512-row tiles: ~85% of HBM roofline in sweeps


def _round_up(x, m):
    return ((x + m - 1) // m) * m


# --------------------------------------------------------------------------- #
# Kernel
# --------------------------------------------------------------------------- #
def _make_kernel(activation, out_activate):
    """Fused 3-layer MLP kernel. bf16 MXU operands, f32 accumulate/activation."""
    if activation == "relu":
        act = lambda v: jnp.maximum(v, 0.0)
    else:
        act = jax.nn.sigmoid

    def kernel(x_ref, w1_ref, b1_ref, w2_ref, b2_ref, w3_ref, b3_ref, o_ref):
        # x arrives f32 straight from HBM (single read of the dominant stream);
        # cast to bf16 in-kernel — VPU work hidden under the MXU.
        x_bf = x_ref[...].astype(jnp.bfloat16)

        # layer1: Linear + activation (f32 accumulation via preferred_element_type)
        h1 = jnp.dot(x_bf, w1_ref[...], preferred_element_type=jnp.float32)
        h1 = act(h1 + b1_ref[...])

        # layer2: Linear + activation
        h2 = jnp.dot(h1.astype(jnp.bfloat16), w2_ref[...],
                     preferred_element_type=jnp.float32)
        h2 = act(h2 + b2_ref[...])

        # layer3: Linear (+ optional activation when out_activate=True)
        o = jnp.dot(h2.astype(jnp.bfloat16), w3_ref[...],
                    preferred_element_type=jnp.float32)
        o = o + b3_ref[...]
        if out_activate:
            o = act(o)
        o_ref[...] = o.astype(o_ref.dtype)

    return kernel


# --------------------------------------------------------------------------- #
# One-time parameter preparation (hoisted out of the per-call forward path)
# --------------------------------------------------------------------------- #
def prepare_params(params):
    """Pad hidden/output dims to lane-dense multiples of 128 and cast weights
    to bf16 once. Biases stay f32 so bias-add + activation use the f32 VPU/EUP
    path. Zero padding is exact: padded activation columns (whatever act(0) is)
    only multiply zero rows of the next weight, contributing nothing to the
    real outputs."""
    w1 = params["w1"]
    w2 = params["w2"]
    w3 = params["w3"]
    b1 = jnp.reshape(params["b1"], (1, -1))
    b2 = jnp.reshape(params["b2"], (1, -1))
    b3 = jnp.reshape(params["b3"], (1, -1))

    h0, h1 = w1.shape[1], w2.shape[1]
    out = w3.shape[1]
    h0p = max(_round_up(h0, 128), 128)
    h1p = max(_round_up(h1, 128), 128)

    return {
        "prepared": True,
        "out_features": int(out),
        "w1": jnp.pad(w1, ((0, 0), (0, h0p - h0))).astype(jnp.bfloat16),
        "b1": jnp.pad(b1, ((0, 0), (0, h0p - h0))),                      # f32
        "w2": jnp.pad(w2, ((0, h0p - h0), (0, h1p - h1))).astype(jnp.bfloat16),
        "b2": jnp.pad(b2, ((0, 0), (0, h1p - h1))),                      # f32
        "w3": jnp.pad(w3, ((0, h1p - h1), (0, _OUTPUT_PAD - out))).astype(jnp.bfloat16),
        "b3": jnp.pad(b3, ((0, 0), (0, _OUTPUT_PAD - out))),             # f32
    }


# --------------------------------------------------------------------------- #
# Forward
# --------------------------------------------------------------------------- #
def _choose_block_b(B):
    if B <= 256:
        # single small tile; multiple of 16 keeps sublane loads unmasked
        return _round_up(B, 16)
    if B < 2 * _DEFAULT_BLOCK_B:
        # guarantee >= 2 grid steps so v7x's second TensorCore gets work
        return _round_up(B, 32) // 2
    return _DEFAULT_BLOCK_B


def net3layers_forward(x, params, *, activation="sigmoid", out_activate=False,
                       block_b=None):
    """x: (B, 784) f32. params: raw dict (w as (in, out)) or output of
    prepare_params (preferred: prepare once, reuse across calls)."""
    if not params.get("prepared", False):
        params = prepare_params(params)

    w1, b1 = params["w1"], params["b1"]
    w2, b2 = params["w2"], params["b2"]
    w3, b3 = params["w3"], params["b3"]
    out_features = params["out_features"]

    B = x.shape[0]
    assert x.shape[1] == _INPUT_SIZE, "expected flattened 28*28 input"
    h0p = w1.shape[1]
    h1p = w2.shape[1]

    if block_b is None:
        block_b = _choose_block_b(B)
    b_pad = _round_up(B, block_b)

    # Only the batch dim is padded; K stays 784 (block == full array dim is
    # legal, MXU pads K internally) and the dtype stays f32 (cast in-kernel).
    x_p = x if b_pad == B else jnp.pad(x, ((0, b_pad - B), (0, 0)))

    grid = (b_pad // block_b,)
    batched = lambda i: (i, 0)     # x / out march over batch tiles
    resident = lambda i: (0, 0)    # weights / biases stay VMEM-resident

    # VMEM budget: x/out double-buffered, weights single-buffered, + slack.
    vmem_bytes = (2 * block_b * _INPUT_SIZE * 4
                  + 2 * block_b * _OUTPUT_PAD * 4
                  + (w1.size + w2.size + w3.size) * 2
                  + (b1.size + b2.size + b3.size) * 4
                  + (2 << 20))
    vmem_limit = int(min(max(vmem_bytes, 32 << 20), 100 << 20))

    flops = 2 * b_pad * (_INPUT_SIZE * h0p + h0p * h1p + h1p * _OUTPUT_PAD)
    transcendentals = b_pad * (h0p + h1p) if activation == "sigmoid" else 0
    bytes_accessed = (x_p.size * 4
                      + (w1.size + w2.size + w3.size) * 2
                      + (b1.size + b2.size + b3.size) * 4
                      + b_pad * _OUTPUT_PAD * 4)
    cost = pl.CostEstimate(flops=flops, transcendentals=transcendentals,
                           bytes_accessed=bytes_accessed)

    kernel = _make_kernel(activation, out_activate)

    def _run(single_buffer_weights):
        res_kw = ({"pipeline_mode": pl.Buffered(1)}
                  if single_buffer_weights else {})
        in_specs = [
            pl.BlockSpec((block_b, _INPUT_SIZE), batched),                 # x (f32)
            pl.BlockSpec((_INPUT_SIZE, h0p), resident, **res_kw),          # w1
            pl.BlockSpec((1, h0p), resident, **res_kw),                    # b1
            pl.BlockSpec((h0p, h1p), resident, **res_kw),                  # w2
            pl.BlockSpec((1, h1p), resident, **res_kw),                    # b2
            pl.BlockSpec((h1p, _OUTPUT_PAD), resident, **res_kw),          # w3
            pl.BlockSpec((1, _OUTPUT_PAD), resident, **res_kw),            # b3
        ]
        return pl.pallas_call(
            kernel,
            out_shape=jax.ShapeDtypeStruct((b_pad, _OUTPUT_PAD), jnp.float32),
            grid=grid,
            in_specs=in_specs,
            out_specs=pl.BlockSpec((block_b, _OUTPUT_PAD), batched),
            compiler_params=pltpu.CompilerParams(
                dimension_semantics=("parallel",),        # both TCs on v7x
                vmem_limit_bytes=vmem_limit),
            cost_estimate=cost,
        )(x_p, w1, b1, w2, b2, w3, b3)

    try:
        out_padded = _run(True)
    except Exception:
        # Fallback for toolchains without pipeline_mode support on BlockSpec;
        # identical numerics, just default double-buffered resident operands.
        out_padded = _run(False)

    return out_padded[:B, :out_features]


# --------------------------------------------------------------------------- #
# Init + reference (match the PyTorch module: xavier_uniform weights, zero bias)
# --------------------------------------------------------------------------- #
def _xavier_uniform(key, fan_in, fan_out):
    bound = math.sqrt(6.0 / (fan_in + fan_out))
    return jax.random.uniform(key, (fan_in, fan_out), jnp.float32,
                              minval=-bound, maxval=bound)


def init_params(key, hidden_size, input_size=_INPUT_SIZE, output_size=_OUTPUT_SIZE):
    k1, k2, k3 = jax.random.split(key, 3)
    h0, h1 = hidden_size
    return {
        "w1": _xavier_uniform(k1, input_size, h0),
        "b1": jnp.zeros((1, h0), jnp.float32),
        "w2": _xavier_uniform(k2, h0, h1),
        "b2": jnp.zeros((1, h1), jnp.float32),
        "w3": _xavier_uniform(k3, h1, output_size),
        "b3": jnp.zeros((1, output_size), jnp.float32),
    }


def _reference(x, p, activation="sigmoid", out_activate=False):
    act = jax.nn.relu if activation == "relu" else jax.nn.sigmoid
    h = act(x @ p["w1"] + p["b1"])
    h = act(h @ p["w2"] + p["b2"])
    o = h @ p["w3"] + p["b3"]
    return act(o) if out_activate else o


if __name__ == "__main__":
    key = jax.random.PRNGKey(0)
    kx, kp = jax.random.split(key)

    hidden_size = (128, 64)
    params = init_params(kp, hidden_size)
    prepared = prepare_params(params)      # one-time pad + bf16 cast

    # --- small batch (single grid step) -----------------------------------
    x_small = jax.random.normal(kx, (8, _INPUT_SIZE), jnp.float32)
    out_small = jax.block_until_ready(net3layers_forward(x_small, prepared))
    ref_small = _reference(x_small, params)
    assert out_small.shape == (8, _OUTPUT_SIZE)
    # bf16 MXU operands -> relaxed tolerance vs the f32 reference.
    assert jnp.allclose(out_small, ref_small, atol=5e-2, rtol=5e-2), \
        "sigmoid path mismatch vs reference"

    # --- mid batch (2 grid steps: exercises megacore split + batch pad) ----
    x_mid = jax.random.normal(jax.random.fold_in(kx, 1), (272, _INPUT_SIZE),
                              jnp.float32)
    out_mid = jax.block_until_ready(net3layers_forward(x_mid, prepared))
    ref_mid = _reference(x_mid, params)
    assert out_mid.shape == (272, _OUTPUT_SIZE)
    assert jnp.allclose(out_mid, ref_mid, atol=5e-2, rtol=5e-2), \
        "batch-tiled path mismatch vs reference"

    # --- relu variant of the module ----------------------------------------
    out_relu = jax.block_until_ready(
        net3layers_forward(x_small, prepared, activation="relu"))
    ref_relu = _reference(x_small, params, activation="relu")
    assert jnp.allclose(out_relu, ref_relu, atol=5e-2, rtol=5e-2), \
        "relu path mismatch vs reference"

    print("KERNEL_OK")
</pallas_src>

<mosaic_0001>
module attributes {stable_mosaic.version = 11 : i64} {
  func.func @kernel(%arg0: i32, %arg1: memref<16x784xf32, #tpu.memory_space<vmem>>, %arg2: memref<784x128xbf16, #tpu.memory_space<vmem>>, %arg3: memref<1x128xf32, #tpu.memory_space<vmem>>, %arg4: memref<128x128xbf16, #tpu.memory_space<vmem>>, %arg5: memref<1x128xf32, #tpu.memory_space<vmem>>, %arg6: memref<128x128xbf16, #tpu.memory_space<vmem>>, %arg7: memref<1x128xf32, #tpu.memory_space<vmem>>, %arg8: memref<16x128xf32, #tpu.memory_space<vmem>>) attributes {dimension_semantics = [#tpu.dimension_semantics<parallel>], iteration_bounds = array<i64: 1>, scalar_prefetch = 0 : i64, scratch_operands = 0 : i64, tpu.core_type = #tpu.core_type<tc>, window_params = [{transform_indices = @transform_0, window_bounds = array<i64: 16, 784>}, {pipeline_mode = #tpu.pipeline_mode<synchronous>, transform_indices = @transform_1, window_bounds = array<i64: 784, 128>}, {pipeline_mode = #tpu.pipeline_mode<synchronous>, transform_indices = @transform_2, window_bounds = array<i64: 1, 128>}, {pipeline_mode = #tpu.pipeline_mode<synchronous>, transform_indices = @transform_3, window_bounds = array<i64: 128, 128>}, {pipeline_mode = #tpu.pipeline_mode<synchronous>, transform_indices = @transform_4, window_bounds = array<i64: 1, 128>}, {pipeline_mode = #tpu.pipeline_mode<synchronous>, transform_indices = @transform_5, window_bounds = array<i64: 128, 128>}, {pipeline_mode = #tpu.pipeline_mode<synchronous>, transform_indices = @transform_6, window_bounds = array<i64: 1, 128>}, {transform_indices = @transform_7, window_bounds = array<i64: 16, 128>}]} {
    %c0 = arith.constant 0 : index
    %c0_0 = arith.constant 0 : index
    %0 = vector.load %arg1[%c0, %c0_0] : memref<16x784xf32, #tpu.memory_space<vmem>>, vector<16x784xf32>
    %1 = arith.truncf %0 : vector<16x784xf32> to vector<16x784xbf16>
    %c0_1 = arith.constant 0 : index
    %c0_2 = arith.constant 0 : index
    %2 = vector.load %arg2[%c0_1, %c0_2] : memref<784x128xbf16, #tpu.memory_space<vmem>>, vector<784x128xbf16>
    %cst = arith.constant dense<0.000000e+00> : vector<16x128xf32>
    %3 = tpu.matmul %1, %2, %cst {dimension_numbers = #tpu.dot_dimension_numbers<[1], [0], [0], [1], [0, 0, 1, 1], [], []>} : vector<16x784xbf16>, vector<784x128xbf16>, vector<16x128xf32> -> vector<16x128xf32>
    %c0_3 = arith.constant 0 : index
    %c0_4 = arith.constant 0 : index
    %4 = vector.load %arg3[%c0_3, %c0_4] : memref<1x128xf32, #tpu.memory_space<vmem>>, vector<1x128xf32>
    %5 = vector.broadcast %4 : vector<1x128xf32> to vector<16x128xf32>
    %6 = arith.addf %3, %5 : vector<16x128xf32>
    %7 = arith.negf %6 : vector<16x128xf32>
    %8 = math.exp %7 : vector<16x128xf32>
    %cst_5 = arith.constant 1.000000e+00 : f32
    %9 = vector.broadcast %cst_5 : f32 to vector<16x128xf32>
    %10 = arith.addf %9, %8 : vector<16x128xf32>
    %11 = arith.divf %9, %10 : vector<16x128xf32>
    %12 = arith.truncf %11 : vector<16x128xf32> to vector<16x128xbf16>
    %c0_6 = arith.constant 0 : index
    %c0_7 = arith.constant 0 : index
    %13 = vector.load %arg4[%c0_6, %c0_7] : memref<128x128xbf16, #tpu.memory_space<vmem>>, vector<128x128xbf16>
    %cst_8 = arith.constant dense<0.000000e+00> : vector<16x128xf32>
    %14 = tpu.matmul %12, %13, %cst_8 {dimension_numbers = #tpu.dot_dimension_numbers<[1], [0], [0], [1], [0, 0, 1, 1], [], []>} : vector<16x128xbf16>, vector<128x128xbf16>, vector<16x128xf32> -> vector<16x128xf32>
    %c0_9 = arith.constant 0 : index
    %c0_10 = arith.constant 0 : index
    %15 = vector.load %arg5[%c0_9, %c0_10] : memref<1x128xf32, #tpu.memory_space<vmem>>, vector<1x128xf32>
    %16 = vector.broadcast %15 : vector<1x128xf32> to vector<16x128xf32>
    %17 = arith.addf %14, %16 : vector<16x128xf32>
    %18 = arith.negf %17 : vector<16x128xf32>
    %19 = math.exp %18 : vector<16x128xf32>
    %cst_11 = arith.constant 1.000000e+00 : f32
    %20 = vector.broadcast %cst_11 : f32 to vector<16x128xf32>
    %21 = arith.addf %20, %19 : vector<16x128xf32>
    %22 = arith.divf %20, %21 : vector<16x128xf32>
    %23 = arith.truncf %22 : vector<16x128xf32> to vector<16x128xbf16>
    %c0_12 = arith.constant 0 : index
    %c0_13 = arith.constant 0 : index
    %24 = vector.load %arg6[%c0_12, %c0_13] : memref<128x128xbf16, #tpu.memory_space<vmem>>, vector<128x128xbf16>
    %cst_14 = arith.constant dense<0.000000e+00> : vector<16x128xf32>
    %25 = tpu.matmul %23, %24, %cst_14 {dimension_numbers = #tpu.dot_dimension_numbers<[1], [0], [0], [1], [0, 0, 1, 1], [], []>} : vector<16x128xbf16>, vector<128x128xbf16>, vector<16x128xf32> -> vector<16x128xf32>
    %c0_15 = arith.constant 0 : index
    %c0_16 = arith.constant 0 : index
    %26 = vector.load %arg7[%c0_15, %c0_16] : memref<1x128xf32, #tpu.memory_space<vmem>>, vector<1x128xf32>
    %27 = vector.broadcast %26 : vector<1x128xf32> to vector<16x128xf32>
    %28 = arith.addf %25, %27 : vector<16x128xf32>
    %c0_17 = arith.constant 0 : index
    %c0_18 = arith.constant 0 : index
    %29 = vector.load %arg8[%c0_17, %c0_18] : memref<16x128xf32, #tpu.memory_space<vmem>>, vector<16x128xf32>
    tpu.vector_store %arg8[%c0_17, %c0_18], %28 {strides = array<i32>} : memref<16x128xf32, #tpu.memory_space<vmem>>, vector<16x128xf32>,
    return
  }
  func.func @transform_0(%arg0: i32) -> (i32, i32) {
    %c0_i32 = arith.constant 0 : i32
    %c0_i32_0 = arith.constant 0 : i32
    return %arg0, %c0_i32 : i32, i32
  }
  func.func @transform_1(%arg0: i32) -> (i32, i32) {
    %c0_i32 = arith.constant 0 : i32
    %c0_i32_0 = arith.constant 0 : i32
    %c0_i32_1 = arith.constant 0 : i32
    return %c0_i32, %c0_i32_0 : i32, i32
  }
  func.func @transform_2(%arg0: i32) -> (i32, i32) {
    %c0_i32 = arith.constant 0 : i32
    %c0_i32_0 = arith.constant 0 : i32
    %c0_i32_1 = arith.constant 0 : i32
    return %c0_i32, %c0_i32_0 : i32, i32
  }
  func.func @transform_3(%arg0: i32) -> (i32, i32) {
    %c0_i32 = arith.constant 0 : i32
    %c0_i32_0 = arith.constant 0 : i32
    %c0_i32_1 = arith.constant 0 : i32
    return %c0_i32, %c0_i32_0 : i32, i32
  }
  func.func @transform_4(%arg0: i32) -> (i32, i32) {
    %c0_i32 = arith.constant 0 : i32
    %c0_i32_0 = arith.constant 0 : i32
    %c0_i32_1 = arith.constant 0 : i32
    return %c0_i32, %c0_i32_0 : i32, i32
  }
  func.func @transform_5(%arg0: i32) -> (i32, i32) {
    %c0_i32 = arith.constant 0 : i32
    %c0_i32_0 = arith.constant 0 : i32
    %c0_i32_1 = arith.constant 0 : i32
    return %c0_i32, %c0_i32_0 : i32, i32
  }
  func.func @transform_6(%arg0: i32) -> (i32, i32) {
    %c0_i32 = arith.constant 0 : i32
    %c0_i32_0 = arith.constant 0 : i32
    %c0_i32_1 = arith.constant 0 : i32
    return %c0_i32, %c0_i32_0 : i32, i32
  }
  func.func @transform_7(%arg0: i32) -> (i32, i32) {
    %c0_i32 = arith.constant 0 : i32
    %c0_i32_0 = arith.constant 0 : i32
    return %arg0, %c0_i32 : i32, i32
  }
}

module attributes {stable_mosaic.version = 11 : i64} {
  func.func @kernel(%arg0: i32, %arg1: memref<16x784xf32, #tpu.memory_space<vmem>>, %arg2: memref<784x128xbf16, #tpu.memory_space<vmem>>, %arg3: memref<1x128xf32, #tpu.memory_space<vmem>>, %arg4: memref<128x128xbf16, #tpu.memory_space<vmem>>, %arg5: memref<1x128xf32, #tpu.memory_space<vmem>>, %arg6: memref<128x128xbf16, #tpu.memory_space<vmem>>, %arg7: memref<1x128xf32, #tpu.memory_space<vmem>>, %arg8: memref<16x128xf32, #tpu.memory_space<vmem>>) attributes {dimension_semantics = [#tpu.dimension_semantics<parallel>], iteration_bounds = array<i64: 1>, scalar_prefetch = 0 : i64, scratch_operands = 0 : i64, tpu.core_type = #tpu.core_type<tc>, window_params = [{transform_indices = @transform_0, window_bounds = array<i64: 16, 784>}, {pipeline_mode = #tpu.pipeline_mode<synchronous>, transform_indices = @transform_1, window_bounds = array<i64: 784, 128>}, {pipeline_mode = #tpu.pipeline_mode<synchronous>, transform_indices = @transform_2, window_bounds = array<i64: 1, 128>}, {pipeline_mode = #tpu.pipeline_mode<synchronous>, transform_indices = @transform_3, window_bounds = array<i64: 128, 128>}, {pipeline_mode = #tpu.pipeline_mode<synchronous>, transform_indices = @transform_4, window_bounds = array<i64: 1, 128>}, {pipeline_mode = #tpu.pipeline_mode<synchronous>, transform_indices = @transform_5, window_bounds = array<i64: 128, 128>}, {pipeline_mode = #tpu.pipeline_mode<synchronous>, transform_indices = @transform_6, window_bounds = array<i64: 1, 128>}, {transform_indices = @transform_7, window_bounds = array<i64: 16, 128>}]} {
    %c0 = arith.constant 0 : index
    %c0_0 = arith.constant 0 : index
    %0 = vector.load %arg1[%c0, %c0_0] : memref<16x784xf32, #tpu.memory_space<vmem>>, vector<16x784xf32>
    %1 = arith.truncf %0 : vector<16x784xf32> to vector<16x784xbf16>
    %c0_1 = arith.constant 0 : index
    %c0_2 = arith.constant 0 : index
    %2 = vector.load %arg2[%c0_1, %c0_2] : memref<784x128xbf16, #tpu.memory_space<vmem>>, vector<784x128xbf16>
    %cst = arith.constant dense<0.000000e+00> : vector<16x128xf32>
    %3 = tpu.matmul %1, %2, %cst {dimension_numbers = #tpu.dot_dimension_numbers<[1], [0], [0], [1], [0, 0, 1, 1], [], []>} : vector<16x784xbf16>, vector<784x128xbf16>, vector<16x128xf32> -> vector<16x128xf32>
    %c0_3 = arith.constant 0 : index
    %c0_4 = arith.constant 0 : index
    %4 = vector.load %arg3[%c0_3, %c0_4] : memref<1x128xf32, #tpu.memory_space<vmem>>, vector<1x128xf32>
    %5 = vector.broadcast %4 : vector<1x128xf32> to vector<16x128xf32>
    %6 = arith.addf %3, %5 : vector<16x128xf32>
    %7 = arith.negf %6 : vector<16x128xf32>
    %8 = math.exp %7 : vector<16x128xf32>
    %cst_5 = arith.constant 1.000000e+00 : f32
    %9 = vector.broadcast %cst_5 : f32 to vector<16x128xf32>
    %10 = arith.addf %9, %8 : vector<16x128xf32>
    %11 = arith.divf %9, %10 : vector<16x128xf32>
    %12 = arith.truncf %11 : vector<16x128xf32> to vector<16x128xbf16>
    %c0_6 = arith.constant 0 : index
    %c0_7 = arith.constant 0 : index
    %13 = vector.load %arg4[%c0_6, %c0_7] : memref<128x128xbf16, #tpu.memory_space<vmem>>, vector<128x128xbf16>
    %cst_8 = arith.constant dense<0.000000e+00> : vector<16x128xf32>
    %14 = tpu.matmul %12, %13, %cst_8 {dimension_numbers = #tpu.dot_dimension_numbers<[1], [0], [0], [1], [0, 0, 1, 1], [], []>} : vector<16x128xbf16>, vector<128x128xbf16>, vector<16x128xf32> -> vector<16x128xf32>
    %c0_9 = arith.constant 0 : index
    %c0_10 = arith.constant 0 : index
    %15 = vector.load %arg5[%c0_9, %c0_10] : memref<1x128xf32, #tpu.memory_space<vmem>>, vector<1x128xf32>
    %16 = vector.broadcast %15 : vector<1x128xf32> to vector<16x128xf32>
    %17 = arith.addf %14, %16 : vector<16x128xf32>
    %18 = arith.negf %17 : vector<16x128xf32>
    %19 = math.exp %18 : vector<16x128xf32>
    %cst_11 = arith.constant 1.000000e+00 : f32
    %20 = vector.broadcast %cst_11 : f32 to vector<16x128xf32>
    %21 = arith.addf %20, %19 : vector<16x128xf32>
    %22 = arith.divf %20, %21 : vector<16x128xf32>
    %23 = arith.truncf %22 : vector<16x128xf32> to vector<16x128xbf16>
    %c0_12 = arith.constant 0 : index
    %c0_13 = arith.constant 0 : index
    %24 = vector.load %arg6[%c0_12, %c0_13] : memref<128x128xbf16, #tpu.memory_space<vmem>>, vector<128x128xbf16>
    %cst_14 = arith.constant dense<0.000000e+00> : vector<16x128xf32>
    %25 = tpu.matmul %23, %24, %cst_14 {dimension_numbers = #tpu.dot_dimension_numbers<[1], [0], [0], [1], [0, 0, 1, 1], [], []>} : vector<16x128xbf16>, vector<128x128xbf16>, vector<16x128xf32> -> vector<16x128xf32>
    %c0_15 = arith.constant 0 : index
    %c0_16 = arith.constant 0 : index
    %26 = vector.load %arg7[%c0_15, %c0_16] : memref<1x128xf32, #tpu.memory_space<vmem>>, vector<1x128xf32>
    %27 = vector.broadcast %26 : vector<1x128xf32> to vector<16x128xf32>
    %28 = arith.addf %25, %27 : vector<16x128xf32>
    %c0_17 = arith.constant 0 : index
    %c0_18 = arith.constant 0 : index
    %29 = vector.load %arg8[%c0_17, %c0_18] : memref<16x128xf32, #tpu.memory_space<vmem>>, vector<16x128xf32>
    tpu.vector_store %arg8[%c0_17, %c0_18], %28 {strides = array<i32>} : memref<16x128xf32, #tpu.memory_space<vmem>>, vector<16x128xf32>,
    return
  }
  func.func @transform_0(%arg0: i32) -> (i32, i32) {
    %c0_i32 = arith.constant 0 : i32
    %c0_i32_0 = arith.constant 0 : i32
    return %arg0, %c0_i32 : i32, i32
  }
  func.func @transform_1(%arg0: i32) -> (i32, i32) {
    %c0_i32 = arith.constant 0 : i32
    %c0_i32_0 = arith.constant 0 : i32
    %c0_i32_1 = arith.constant 0 : i32
    return %c0_i32, %c0_i32_0 : i32, i32
  }
  func.func @transform_2(%arg0: i32) -> (i32, i32) {
    %c0_i32 = arith.constant 0 : i32
    %c0_i32_0 = arith.constant 0 : i32
    %c0_i32_1 = arith.constant 0 : i32
    return %c0_i32, %c0_i32_0 : i32, i32
  }
  func.func @transform_3(%arg0: i32) -> (i32, i32) {
    %c0_i32 = arith.constant 0 : i32
    %c0_i32_0 = arith.constant 0 : i32
    %c0_i32_1 = arith.constant 0 : i32
    return %c0_i32, %c0_i32_0 : i32, i32
  }
  func.func @transform_4(%arg0: i32) -> (i32, i32) {
    %c0_i32 = arith.constant 0 : i32
    %c0_i32_0 = arith.constant 0 : i32
    %c0_i32_1 = arith.constant 0 : i32
    return %c0_i32, %c0_i32_0 : i32, i32
  }
  func.func @transform_5(%arg0: i32) -> (i32, i32) {
    %c0_i32 = arith.constant 0 : i32
    %c0_i32_0 = arith.constant 0 : i32
    %c0_i32_1 = arith.constant 0 : i32
    return %c0_i32, %c0_i32_0 : i32, i32
  }
  func.func @transform_6(%arg0: i32) -> (i32, i32) {
    %c0_i32 = arith.constant 0 : i32
    %c0_i32_0 = arith.constant 0 : i32
    %c0_i32_1 = arith.constant 0 : i32
    return %c0_i32, %c0_i32_0 : i32, i32
  }
  func.func @transform_7(%arg0: i32) -> (i32, i32) {
    %c0_i32 = arith.constant 0 : i32
    %c0_i32_0 = arith.constant 0 : i32
    return %arg0, %c0_i32 : i32, i32
  }
}

</mosaic_0001>

<bundles_post_ra>
// kernel: tpu_custom_call.1
= control target key start
LH: loop header
LB: loop body
LE: loop exit
PB: predicated region body
PF: predicated region fallthrough
CT: control target
= control target key end

     0   :  { %12 = vsyncpa [#allocation3], 0  ;;  %s1520_s0 = inlined_call_operand.hbm [shape: f32[16,784], index: 0, kind: input, shape index: {}]   ;;  %s1521_s1 = inlined_call_operand.hbm [shape: bf16[784,128], index: 1, kind: input, shape index: {}]   ;;  %s1522_s2 = inlined_call_operand.vmem [shape: f32[1,128], index: 2, kind: input, shape index: {}]   ;;  %s1523_s3 = inlined_call_operand.hbm [shape: bf16[128,128], index: 3, kind: input, shape index: {}]   ;;  %s1524_s4 = inlined_call_operand.vmem [shape: f32[1,128], index: 4, kind: input, shape index: {}]   ;;  %s1525_s5 = inlined_call_operand.hbm [shape: bf16[128,128], index: 5, kind: input, shape index: {}]   ;;  %s1526_s6 = inlined_call_operand.vmem [shape: f32[1,128], index: 6, kind: input, shape index: {}]   ;;  %s1527_s7 = inlined_call_operand.hbm [shape: f32[16,128], index: 7, kind: output, shape index: {}]  }
   0x1   :  { %13 = vsyncpa [#allocation6], 0 }
   0x2   :  { %14 = vsyncpa [#allocation9], 0 }
   0x3   :  { %15 = vsyncpa [#allocation4], 0  ;;  %s1359_s24 = smov [#allocation5]   ;;  %s1241_s28 = scalar_lea.hbm %s1521_s1, 6272 }
   0x4   :  { %s33_s25 = sshll.u32 %s1359_s24, 4  ;;  %p1242_p0 = scmp.ne.s32.totalorder %s1521_s1, %s1241_s28  ;;  %s34_s25 = int_to_ptr.vmem [resolvable:$true] %s33_s25 }
   0x5   :  { %p1245_p1 = scmp.lt.u32.totalorder %s1241_s28, %s1521_s1 }
   0x7   :  { %p1247_p2 = pnand %p1245_p1, %p1242_p0 }
   0x9   :  { %1250 = shalt.err (!%p1247_p2)
}
   0xa   :  { %s1251_s10 = scalar_lea.vmem %s34_s25, 6272  ;;  %p1256_p4 = scmp.lt.s32.totalorder %s34_s25, %s34_s25 }
   0xb   :  { %p1252_p3 = scmp.ne.s32.totalorder %s34_s25, %s1251_s10  ;;  %p1257_p5 = scmp.lt.s32.totalorder %s1251_s10, %s1251_s10 }
   0xd   :  { %p1258_p6 = por %p1257_p5, %p1256_p4 }
   0xf   :  { %p1259_p7 = pnand %p1258_p6, %p1252_p3 }
  0x11   :  { %1262 = shalt.err (!%p1259_p7)
}
  0x12   :  { %s1360_s11 = smov 64   ;;  %s1361_s12 = smov 4  }
  0x13   :  { %39 = dma.hbm_to_vmem [thread:$0]  %s1521_s1, 6272, %s34_s25, [#allocation6], %s1360_s11, %s1360_s11, %s1361_s12  }
  0x14   :  { %s1362_s15 = smov [#allocation2]   ;;  %s1263_s19 = scalar_lea.hbm %s1520_s0, 1792 }
  0x15   :  { %s21_s16 = sshll.u32 %s1362_s15, 4  ;;  %p1264_p8 = scmp.ne.s32.totalorder %s1520_s0, %s1263_s19  ;;  %s22_s16 = int_to_ptr.vmem [resolvable:$true] %s21_s16 }
  0x16   :  { %p1267_p9 = scmp.lt.u32.totalorder %s1263_s19, %s1520_s0 }
  0x18   :  { %p1269_p10 = pnand %p1267_p9, %p1264_p8 }
  0x1a   :  { %1272 = shalt.err (!%p1269_p10)
}
  0x1b   :  { %s1273_s24 = scalar_lea.vmem %s22_s16, 1792  ;;  %p1278_p12 = scmp.lt.s32.totalorder %s22_s16, %s22_s16 }
  0x1c   :  { %p1274_p11 = scmp.ne.s32.totalorder %s22_s16, %s1273_s24  ;;  %p1279_p13 = scmp.lt.s32.totalorder %s1273_s24, %s1273_s24 }
  0x1e   :  { %p1280_p0 = por %p1279_p13, %p1278_p12 }
  0x20   :  { %p1281_p1 = pnand %p1280_p0, %p1274_p11 }
  0x22   :  { %1284 = shalt.err (!%p1281_p1)
}
  0x23   :  { %s1363_s1 = smov 896   ;;  %s1364_s25 = smov 56  }
  0x24   :  { %27 = dma.hbm_to_vmem [thread:$0]  %s1520_s0, 1792, %s22_s16, [#allocation3], %s1363_s1, %s1363_s1, %s1364_s25  }
  0x25   :  { %s1365_s28 = smov [#allocation7]   ;;  %s1366_s30 = smov [#allocation8]  }
  0x26   :  { %s47_s29 = sshll.u32 %s1365_s28, 4  ;;  %s61_s8 = sshll.u32 %s1366_s30, 4  ;;  %s48_s29 = int_to_ptr.vmem [resolvable:$true] %s47_s29  ;;  %s1439_s8 = int_to_ptr.vmem [resolvable:$true] %s61_s8 }
  0x27   :  { %s1285_s13 = scalar_lea.hbm %s1523_s3, 1024 }
  0x28   :  { %p1286_p2 = scmp.ne.s32.totalorder %s1523_s3, %s1285_s13  ;;  %p1289_p3 = scmp.lt.u32.totalorder %s1285_s13, %s1523_s3 }
  0x2a   :  { %p1291_p4 = pnand %p1289_p3, %p1286_p2 }
  0x2c   :  { %1294 = shalt.err (!%p1291_p4)
}
  0x2d   :  { %s1295_s0 = scalar_lea.vmem %s48_s29, 1024  ;;  %p1300_p6 = scmp.lt.s32.totalorder %s48_s29, %s48_s29 }
  0x2e   :  { %p1296_p5 = scmp.ne.s32.totalorder %s48_s29, %s1295_s0  ;;  %p1301_p7 = scmp.lt.s32.totalorder %s1295_s0, %s1295_s0 }
  0x30   :  { %p1302_p8 = por %p1301_p7, %p1300_p6 }
  0x32   :  { %p1303_p9 = pnand %p1302_p8, %p1296_p5 }
  0x34   :  { %1306 = shalt.err (!%p1303_p9)
}
  0x35   :  { %53 = dma.hbm_to_vmem [thread:$0]  %s1523_s3, 1024, %s48_s29, [#allocation6], %s1360_s11, %s1360_s11, %s1361_s12  }
  0x36   :  { %s1307_s22 = scalar_lea.hbm %s1525_s5, 1024 }
  0x37   :  { %p1308_p10 = scmp.ne.s32.totalorder %s1525_s5, %s1307_s22  ;;  %p1311_p11 = scmp.lt.u32.totalorder %s1307_s22, %s1525_s5 }
  0x39   :  { %p1313_p12 = pnand %p1311_p11, %p1308_p10 }
  0x3b   :  { %1316 = shalt.err (!%p1313_p12)
}
  0x3c   :  { %s1317_s26 = scalar_lea.vmem %s1439_s8, 1024  ;;  %p1322_p0 = scmp.lt.s32.totalorder %s1439_s8, %s1439_s8 }
  0x3d   :  { %p1318_p13 = scmp.ne.s32.totalorder %s1439_s8, %s1317_s26  ;;  %p1323_p1 = scmp.lt.s32.totalorder %s1317_s26, %s1317_s26 }
  0x3f   :  { %p1324_p2 = por %p1323_p1, %p1322_p0 }
  0x41   :  { %p1325_p3 = pnand %p1324_p2, %p1318_p13 }
  0x43   :  { %1328 = shalt.err (!%p1325_p3)
}
  0x44   :  { %67 = dma.hbm_to_vmem [thread:$0]  %s1525_s5, 1024, %s1439_s8, [#allocation9], %s1360_s11, %s1360_s11, %s1361_s12  }
  0x45   :  { %1351 = dma.done.wait [#allocation3], 1792  }
  0x46   :  { %1352 = vsyncadd [#allocation3], 4294965504 }
  0x47   :  { %1353 = dma.done.wait [#allocation6], 7296  }
  0x48   :  { %1354 = vsyncadd [#allocation6], 4294960000 }
  0x49   :  { %1355 = dma.done.wait [#allocation9], 1024  }
  0x4a   :  { %1356 = vsyncadd [#allocation9], 4294966272  ;;  %v1160_v0 = vld [vmem:[#allocation5 + $0x40] sm:$0xff]   ;;  %v1164_v4 = vld [vmem:[#allocation5 + $0x48] sm:$0xff]   ;;  %v1367_v43 = vmov 0.0   ;;  %vm1368_vm0 = vmmov 0  }
  0x4b   :  { %v1161_v1 = vld [vmem:[#allocation5] sm:$0xff]   ;;  %1015 = vmatprep.subr.bf16.mxu0 %v1160_v0  ;;  %v1165_v5 = vld [vmem:[#allocation5 + $0x8] sm:$0xff]   ;;  %v1168_v8 = vld [vmem:[#allocation5 + $0x50] sm:$0xff]   ;;  %vm503_vm1 = vcmask 130048   ;;  %s1369_s29 = smov [#allocation10]  }
  0x4c   :  { %v1162_v2 = vld [vmem:[#allocation5 + $0xc0] sm:$0xff]   ;;  %1016 = vmatpush3.bf16.msra.mxu0 %v1161_v1  ;;  %v1166_v6 = vld [vmem:[#allocation5 + $0xc8] sm:$0xff]   ;;  %v1169_v9 = vld [vmem:[#allocation5 + $0x10] sm:$0xff]   ;;  %s928_s30 = sshll.u32 %s1369_s29, 4  ;;  %s929_s30 = int_to_ptr.vmem [resolvable:$true] %s928_s30 }
  0x4d   :  { %v1163_v3 = vld [vmem:[#allocation5 + $0x80] sm:$0xff]   ;;  %1037 = vmatprep.subr.bf16.mxu1 %v1162_v2  ;;  %1017 = vmatprep.subr.bf16.mxu0 %v1164_v4  ;;  %v1167_v7 = vld [vmem:[#allocation5 + $0x88] sm:$0xff]   ;;  %v1170_v10 = vld [vmem:[#allocation5 + $0xd0] sm:$0xff]   ;;  %s1329_s8 = scalar_lea.vmem %s929_s30, 256  ;;  %p1334_p5 = scmp.lt.s32.totalorder %s929_s30, %s929_s30 }
  0x4e   :  { %1038 = vmatpush3.bf16.msra.mxu1 %v1163_v3  ;;  %v1171_v11 = vld [vmem:[#allocation5 + $0x90] sm:$0xff]   ;;  %v1172_v12 = vld [vmem:[#allocation5 + $0x58] sm:$0xff]   ;;  %v1176_v16 = vld [vmem:[#allocation5 + $0x60] sm:$0xff]   ;;  %p1330_p4 = scmp.ne.s32.totalorder %s929_s30, %s1329_s8  ;;  %p1335_p6 = scmp.lt.s32.totalorder %s1329_s8, %s1329_s8 }
  0x4f   :  { %1039 = vmatprep.subr.bf16.mxu1 %v1166_v6  ;;  %v1173_v13 = vld [vmem:[#allocation5 + $0x18] sm:$0xff]   ;;  %v1177_v17 = vld [vmem:[#allocation5 + $0x20] sm:$0xff]   ;;  %v1180_v20 = vld [vmem:[#allocation5 + $0x68] sm:$0xff]  }
  0x50   :  { %1018 = vmatpush3.bf16.msra.mxu0 %v1165_v5  ;;  %v1174_v14 = vld [vmem:[#allocation5 + $0xd8] sm:$0xff]   ;;  %v1178_v18 = vld [vmem:[#allocation5 + $0xe0] sm:$0xff]   ;;  %v1181_v21 = vld [vmem:[#allocation5 + $0x28] sm:$0xff]   ;;  %p1336_p7 = por %p1335_p6, %p1334_p5 }
  0x51   :  { %1019 = vmatprep.subr.bf16.mxu0 %v1168_v8  ;;  %v1175_v15 = vld [vmem:[#allocation5 + $0x98] sm:$0xff]   ;;  %v1179_v19 = vld [vmem:[#allocation5 + $0xa0] sm:$0xff]   ;;  %v1182_v22 = vld [vmem:[#allocation5 + $0xe8] sm:$0xff]  }
  0x52   :  { %1040 = vmatpush3.bf16.msra.mxu1 %v1167_v7  ;;  %v1183_v23 = vld [vmem:[#allocation5 + $0xa8] sm:$0xff]   ;;  %v1184_v24 = vld [vmem:[#allocation5 + $0x70] sm:$0xff]   ;;  %v1188_v28 = vld [vmem:[#allocation5 + $0x78] sm:$0xff]   ;;  %p1337_p8 = pnand %p1336_p7, %p1330_p4 }
  0x53   :  { %1041 = vmatprep.subr.bf16.mxu1 %v1170_v10  ;;  %v1185_v25 = vld [vmem:[#allocation5 + $0x30] sm:$0xff]   ;;  %v1189_v29 = vld [vmem:[#allocation5 + $0x38] sm:$0xff]   ;;  %v90_v36 = vld [vmem:[#allocation2 + $0x38] sm:$0xff] }
  0x54   :  { %1020 = vmatpush3.bf16.msra.mxu0 %v1169_v9  ;;  %v1186_v26 = vld [vmem:[#allocation5 + $0xf0] sm:$0xff]   ;;  %v1190_v30 = vld [vmem:[#allocation5 + $0xf8] sm:$0xff]   ;;  %v1192_v38 = vld [vmem:[#allocation5 + $0x140] sm:$0xff]  }
  0x55   :  { %1021 = vmatprep.subr.bf16.mxu0 %v1172_v12  ;;  %v1187_v27 = vld [vmem:[#allocation5 + $0xb0] sm:$0xff]   ;;  %v84_v31 = vld [vmem:[#allocation2 + $0x8] sm:$0xff]  ;;  %v86_v39 = vld [vmem:[#allocation2 + $0x18] sm:$0xff] }
  0x56   :  { %1042 = vmatpush3.bf16.msra.mxu1 %v1171_v11  ;;  %v91_v32 = vld [vmem:[#allocation2 + $0x40] sm:$0xff]  ;;  %v1191_v34 = vld [vmem:[#allocation5 + $0xb8] sm:$0xff]   ;;  %v93_v40 = vld [vmem:[#allocation2 + $0x50] sm:$0xff] }
  0x57   :  { %1043 = vmatprep.subr.bf16.mxu1 %v1174_v14  ;;  %v98_v33 = vpack.c.bf16 %v91_v32, %v84_v31  ;;  %v83_v35 = vld [vmem:[#allocation2] sm:$0xff]  ;;  %v100_v41 = vpack.c.bf16 %v93_v40, %v86_v39  ;;  %v1193_v42 = vld [vmem:[#allocation5 + $0x100] sm:$0xff]   ;;  %v92_v45 = vld [vmem:[#allocation2 + $0x48] sm:$0xff] }
  0x58   :  { %1022 = vmatpush3.bf16.msra.mxu0 %v1173_v13  ;;  %v97_v37 = vpack.c.bf16 %v90_v36, %v83_v35  ;;  %v85_v44 = vld [vmem:[#allocation2 + $0x10] sm:$0xff]  ;;  %v1194_v47 = vld [vmem:[#allocation5 + $0x148] sm:$0xff]   ;;  %v1196_v49 = vld [vmem:[#allocation5 + $0x150] sm:$0xff]  }
  0x59   :  { %1023 = vmatprep.subr.bf16.mxu0 %v1176_v16  ;;  %539 = vmatprep.mubr.bf16.mxu0 %v98_v33  ;;  %v99_v46 = vpack.c.bf16 %v92_v45, %v85_v44  ;;  %v1195_v48 = vld [vmem:[#allocation5 + $0x108] sm:$0xff]   ;;  %v1197_v50 = vld [vmem:[#allocation5 + $0x110] sm:$0xff]   ;;  %v1198_v51 = vld [vmem:[#allocation5 + $0x158] sm:$0xff]  }
  0x5a   :  { %1044 = vmatpush3.bf16.msra.mxu1 %v1175_v15  ;;  %580 = vmatprep.mubr.bf16.mxu1 %v100_v41  ;;  %v1199_v52 = vld [vmem:[#allocation5 + $0x118] sm:$0xff]   ;;  %v1200_v53 = vld [vmem:[#allocation5 + $0x160] sm:$0xff]   ;;  %v1202_v55 = vld [vmem:[#allocation5 + $0x168] sm:$0xff]  }
  0x5b   :  { %1045 = vmatprep.subr.bf16.mxu1 %v1178_v18  ;;  %v1201_v54 = vld [vmem:[#allocation5 + $0x120] sm:$0xff]   ;;  %v88_v57 = vld [vmem:[#allocation2 + $0x28] sm:$0xff]  ;;  %v1203_v58 = vld [vmem:[#allocation5 + $0x128] sm:$0xff]  }
  0x5c   :  { %1024 = vmatpush3.bf16.msra.mxu0 %v1177_v17  ;;  %v1208_v56 = vld [vmem:[#allocation5 + $0x180] sm:$0xff]   ;;  %v1204_v59 = vld [vmem:[#allocation5 + $0x170] sm:$0xff]   ;;  %v96_v63 = vld [vmem:[#allocation2 + $0x68] sm:$0xff] }
  0x5d   :  { %1025 = vmatprep.subr.bf16.mxu0 %v1180_v20  ;;  %v95_v60 = vld [vmem:[#allocation2 + $0x60] sm:$0xff]  ;;  %v89_v62 = vld [vmem:[#allocation2 + $0x30] sm:$0xff]  ;;  %v1206_v2 = vld [vmem:[#allocation5 + $0x178] sm:$0xff]  }
  0x5e   :  { %1046 = vmatpush3.bf16.msra.mxu1 %v1179_v19  ;;  %v102_v61 = vpack.c.bf16 %v95_v60, %v88_v57  ;;  %v103_v0 = vpack.c.bf16 %v96_v63, %v89_v62  ;;  %v1205_v1 = vld [vmem:[#allocation5 + $0x130] sm:$0xff]   ;;  %v1207_v3 = vld [vmem:[#allocation5 + $0x138] sm:$0xff]   ;;  %v94_v5 = vld [vmem:[#allocation2 + $0x58] sm:$0xff] }
  0x5f   :  { %1047 = vmatprep.subr.bf16.mxu1 %v1182_v22  ;;  %v87_v4 = vld [vmem:[#allocation2 + $0x20] sm:$0xff]  ;;  %v1209_v7 = vld [vmem:[#allocation7] sm:$0xff]   ;;  %v1211_v9 = vld [vmem:[#allocation7 + $0x10] sm:$0xff]  }
  0x60   :  { %1026 = vmatpush3.bf16.msra.mxu0 %v1181_v21  ;;  %v101_v6 = vpack.c.bf16 %v94_v5, %v87_v4  ;;  %v1210_v8 = vld [vmem:[#allocation7 + $0x8] sm:$0xff]   ;;  %v1212_v10 = vld [vmem:[#allocation7 + $0x18] sm:$0xff]   ;;  %v1213_v11 = vld [vmem:[#allocation7 + $0x20] sm:$0xff]  }
  0x61   :  { %1027 = vmatprep.subr.bf16.mxu0 %v1184_v24  ;;  %v1214_v12 = vld [vmem:[#allocation7 + $0x28] sm:$0xff]   ;;  %v1215_v13 = vld [vmem:[#allocation7 + $0x30] sm:$0xff]   ;;  %v1216_v14 = vld [vmem:[#allocation7 + $0x38] sm:$0xff]  }
  0x62   :  { %1048 = vmatpush3.bf16.msra.mxu1 %v1183_v23  ;;  %v942_v16 = vld [vmem:[%s1522_s2] ss:$0 sm:$0xff]  ;;  %v1221_v60 = vld [vmem:[#allocation8 + $0x20] sm:$0xff]   ;;  %v1223_v62 = vld [vmem:[#allocation8 + $0x30] sm:$0xff]  }
  0x63   :  { %1049 = vmatprep.subr.bf16.mxu1 %v1186_v26  ;;  %v1218_v57 = vld [vmem:[#allocation8 + $0x8] sm:$0xff]   ;;  %v1224_v63 = vld [vmem:[#allocation8 + $0x38] sm:$0xff]  }
  0x64   :  { %1028 = vmatpush3.bf16.msra.mxu0 %v1185_v25 }
  0x65   :  { %1029 = vmatprep.subr.bf16.mxu0 %v1188_v28 }
  0x66   :  { %1050 = vmatpush3.bf16.msra.mxu1 %v1187_v27 }
  0x67   :  { %1051 = vmatprep.subr.bf16.mxu1 %v1190_v30 }
  0x68   :  { %1030 = vmatpush3.bf16.msra.mxu0 %v1189_v29 }
  0x69   :  { %1059 = vmatprep.subr.bf16.mxu0 %v1192_v38 }
  0x6a   :  { %1052 = vmatpush3.bf16.msra.mxu1 %v1191_v34 }
  0x6b   :  { %1101 = vmatprep.subr.bf16.mxu1 %v1367_v43  ;;  %540 = vmatmul.mubr.bf16.vlgmr.msra.gmra.mrb[0].mxu0 %v97_v37 }
  0x6c   :  { %1060 = vmatpush3.bf16.msra.mxu0 %v1193_v42  ;;  %621 = vmatprep.mubr.bf16.mxu0 %v102_v61  ;;  %v1222_v61 = vld [vmem:[#allocation8 + $0x28] sm:$0xff]  }
  0x6d   :  { %581 = vmatmul.mubr.bf16.vlgmr.msra.gmra.mrb[0].mxu1 %v99_v46  ;;  %1061 = vmatprep.subr.bf16.mxu0 %v1194_v47 }
  0x6e   :  { %1103 = vmatprep.mubr.msk.bf16.mxu1 %vm1368_vm0, %v1367_v43  ;;  %1102 = vmatpush3.bf16.msra.mxu1 %v1208_v56  ;;  %v1217_v56 = vld [vmem:[#allocation8] sm:$0xff]  }
  0x6f   :  { %1107 = vmatprep.subr.bf16.mxu1 %v1367_v43 }
  0x70   :  { %1062 = vmatpush3.bf16.msra.mxu0 %v1195_v48 }
  0x71   :  { %1063 = vmatprep.subr.bf16.mxu0 %v1196_v49 }
  0x74   :  { %1064 = vmatpush3.bf16.msra.mxu0 %v1197_v50 }
  0x75   :  { %1065 = vmatprep.subr.bf16.mxu0 %v1198_v51  ;;  %1104 = vmatmul.mubr.msk.bf16.vlgmr.msra.gmra.mrb[4].mxu1 %vm503_vm1, %v103_v0  ;;  %v995_v0 = vld [vmem:[%s1524_s4] ss:$0 sm:$0xff] }
  0x76   :  { %1123 = vmatprep.mubr.msk.bf16.mxu1 %vm1368_vm0, %v1367_v43  ;;  %1108 = vmatpush3.bf16.msra.mxu1 %v1209_v7 }
  0x77   :  { %1109 = vmatprep.subr.bf16.mxu1 %v1367_v43 }
  0x78   :  { %1066 = vmatpush3.bf16.msra.mxu0 %v1199_v52 }
  0x79   :  { %1067 = vmatprep.subr.bf16.mxu0 %v1200_v53 }
  0x7a   :  { %1110 = vmatpush3.bf16.msra.mxu1 %v1210_v8 }
  0x7b   :  { %1111 = vmatprep.subr.bf16.mxu1 %v1367_v43 }
  0x7c   :  { %1068 = vmatpush3.bf16.msra.mxu0 %v1201_v54 }
  0x7d   :  { %1069 = vmatprep.subr.bf16.mxu0 %v1202_v55 }
  0x7e   :  { %1112 = vmatpush3.bf16.msra.mxu1 %v1211_v9 }
  0x7f   :  { %1113 = vmatprep.subr.bf16.mxu1 %v1367_v43 }
  0x80   :  { %1070 = vmatpush3.bf16.msra.mxu0 %v1203_v58  ;;  %v1219_v58 = vld [vmem:[#allocation8 + $0x10] sm:$0xff]  }
  0x81   :  { %1071 = vmatprep.subr.bf16.mxu0 %v1204_v59  ;;  %v1220_v59 = vld [vmem:[#allocation8 + $0x18] sm:$0xff]  }
  0x82   :  { %1114 = vmatpush3.bf16.msra.mxu1 %v1212_v10 }
  0x83   :  { %1115 = vmatprep.subr.bf16.mxu1 %v1367_v43 }
  0x84   :  { %1072 = vmatpush3.bf16.msra.mxu0 %v1205_v1 }
  0x85   :  { %1073 = vmatprep.subr.bf16.mxu0 %v1206_v2 }
  0x86   :  { %1116 = vmatpush3.bf16.msra.mxu1 %v1213_v11 }
  0x87   :  { %1117 = vmatprep.subr.bf16.mxu1 %v1367_v43 }
  0x88   :  { %1074 = vmatpush3.bf16.msra.mxu0 %v1207_v3 }
  0x89   :  { %1127 = vmatprep.subr.bf16.mxu0 %v1367_v43 }
  0x8a   :  { %1118 = vmatpush3.bf16.msra.mxu1 %v1214_v12 }
  0x8b   :  { %622 = vmatmul.mubr.bf16.vlgmr.msra.gmra.mrb[4].mxu0 %v101_v6  ;;  %1119 = vmatprep.subr.bf16.mxu1 %v1367_v43 }
  0x8c   :  { %1143 = vmatprep.mubr.msk.bf16.mxu0 %vm1368_vm0, %v1367_v43  ;;  %1128 = vmatpush3.bf16.msra.mxu0 %v1217_v56 }
  0x8d   :  { %1129 = vmatprep.subr.bf16.mxu0 %v1367_v43 }
  0x8e   :  { %1120 = vmatpush3.bf16.msra.mxu1 %v1215_v13 }
  0x8f   :  { %1121 = vmatprep.subr.bf16.mxu1 %v1367_v43 }
  0x90   :  { %1130 = vmatpush3.bf16.msra.mxu0 %v1218_v57 }
  0x91   :  { %1131 = vmatprep.subr.bf16.mxu0 %v1367_v43 }
  0x92   :  { %1122 = vmatpush3.bf16.msra.mxu1 %v1216_v14 }
  0x94   :  { %1132 = vmatpush3.bf16.msra.mxu0 %v1219_v58 }
  0x95   :  { %1133 = vmatprep.subr.bf16.mxu0 %v1367_v43 }
  0x98   :  { %1134 = vmatpush3.bf16.msra.mxu0 %v1220_v59 }
  0x99   :  { %1135 = vmatprep.subr.bf16.mxu0 %v1367_v43 }
  0x9c   :  { %1136 = vmatpush3.bf16.msra.mxu0 %v1221_v60 }
  0x9d   :  { %1137 = vmatprep.subr.bf16.mxu0 %v1367_v43 }
  0xa0   :  { %1138 = vmatpush3.bf16.msra.mxu0 %v1222_v61 }
  0xa1   :  { %1139 = vmatprep.subr.bf16.mxu0 %v1367_v43 }
  0xa4   :  { %1140 = vmatpush3.bf16.msra.mxu0 %v1223_v62 }
  0xa5   :  { %1141 = vmatprep.subr.bf16.mxu0 %v1367_v43 }
  0xa8   :  { %1142 = vmatpush3.bf16.msra.mxu0 %v1224_v63 }
 0x13e   :  { %v1031_v15 = vpop.f32.mrb[0].mxu0 }
 0x13f   :  { %v1032_v17 = vpop.f32.mrb[1].mxu0 }
 0x140   :  { %v1033_v18 = vadd.f32 %v1032_v17, %v1031_v15  ;;  %v1034_v19 = vpop.f32.mrb[2].mxu0  ;;  %v1053_v20 = vpop.f32.mrb[0].mxu1  ;;  %v1006_v15 = vld [vmem:[%s1526_s6] ss:$0 sm:$0xff] }
 0x141   :  { %v1035_v21 = vpop.f32.mrb[3].mxu0  ;;  %v1054_v24 = vpop.f32.mrb[1].mxu1 }
 0x142   :  { %v542_v22 = vadd.f32 %v1033_v18, %v942_v16  ;;  %v1036_v23 = vadd.f32 %v1035_v21, %v1034_v19  ;;  %v1055_v25 = vadd.f32 %v1054_v24, %v1053_v20  ;;  %v1056_v26 = vpop.f32.mrb[2].mxu1 }
 0x143   :  { %v1057_v28 = vpop.f32.mrb[3].mxu1 }
 0x144   :  { %v545_v27 = vadd.f32 %v1036_v23, %v942_v16  ;;  %v583_v29 = vadd.f32 %v1055_v25, %v542_v22  ;;  %v1058_v30 = vadd.f32 %v1057_v28, %v1056_v26 }
 0x146   :  { %v586_v31 = vadd.f32 %v1058_v30, %v545_v27 }
 0x148   :  { %v664_v32 = vpop.f32.mrb[4].mxu1 }
 0x149   :  { %v1105_v33 = vpop.f32.mrb[5].mxu1 }
 0x14a   :  { %v667_v34 = vpop.f32.mrb[6].mxu1 }
 0x14b   :  { %v1106_v35 = vpop.f32.mrb[7].mxu1 }
 0x15e   :  { %v1075_v36 = vpop.f32.mrb[4].mxu0 }
 0x15f   :  { %v1076_v37 = vpop.f32.mrb[5].mxu0 }
 0x160   :  { %v1077_v38 = vadd.f32 %v1076_v37, %v1075_v36  ;;  %v1078_v39 = vpop.f32.mrb[6].mxu0 }
 0x161   :  { %v1079_v40 = vpop.f32.mrb[7].mxu0 }
 0x162   :  { %v624_v41 = vadd.f32 %v1077_v38, %v583_v29  ;;  %v1080_v42 = vadd.f32 %v1079_v40, %v1078_v39 }
 0x164   :  { %v665_v44 = vadd.f32 %v664_v32, %v624_v41  ;;  %v627_v45 = vadd.f32 %v1080_v42, %v586_v31 }
 0x166   :  { %v993_v46 = vmul.f32 -1.442695, %v665_v44  ;;  %v668_v47 = vadd.f32 %v667_v34, %v627_v45 }
 0x168   :  { %1225 = vpow2.f32 %v993_v46  ;;  %v994_v48 = vmul.f32 -1.442695, %v668_v47 }
 0x16a   :  { %1227 = vpow2.f32 %v994_v48 }
 0x172   :  { %v1226_v49 = vpop.eup %1225 }
 0x173   :  { %v677_v50 = vadd.f32 1.0, %v1226_v49 }
 0x174   :  { %v1228_v51 = vpop.eup %1227 }
 0x175   :  { %v678_v52 = vadd.f32 1.0, %v1228_v51  ;;  %1229 = vrcp.f32 %v677_v50 }
 0x177   :  { %1231 = vrcp.f32 %v678_v52 }
 0x17f   :  { %v1230_v53 = vpop.eup %1229 }
 0x181   :  { %v1232_v54 = vpop.eup %1231 }
 0x182   :  { %v683_v55 = vpack.c.bf16 %v1232_v54, %v1230_v53 }
 0x184   :  { %1124 = vmatmul.mubr.bf16.vlgmr.msra.gmra.mrb[8].mxu1 %v683_v55 }
 0x257   :  { %v789_v1 = vpop.f32.mrb[8].mxu1 }
 0x258   :  { %v790_v2 = vadd.f32 %v995_v0, %v789_v1  ;;  %v1125_v3 = vpop.f32.mrb[9].mxu1 }
 0x259   :  { %v792_v4 = vpop.f32.mrb[10].mxu1 }
 0x25a   :  { %v1004_v5 = vmul.f32 -1.442695, %v790_v2  ;;  %v793_v6 = vadd.f32 %v995_v0, %v792_v4  ;;  %v1126_v7 = vpop.f32.mrb[11].mxu1 }
 0x25c   :  { %1233 = vpow2.f32 %v1004_v5  ;;  %v1005_v8 = vmul.f32 -1.442695, %v793_v6 }
 0x25e   :  { %1235 = vpow2.f32 %v1005_v8 }
 0x266   :  { %v1234_v9 = vpop.eup %1233 }
 0x267   :  { %v802_v10 = vadd.f32 1.0, %v1234_v9 }
 0x268   :  { %v1236_v11 = vpop.eup %1235 }
 0x269   :  { %v803_v12 = vadd.f32 1.0, %v1236_v11  ;;  %1237 = vrcp.f32 %v802_v10 }
 0x26b   :  { %1239 = vrcp.f32 %v803_v12 }
 0x273   :  { %v1238_v43 = vpop.eup %1237 }
 0x275   :  { %v1240_v13 = vpop.eup %1239 }
 0x276   :  { %v808_v14 = vpack.c.bf16 %v1240_v13, %v1238_v43 }
 0x278   :  { %1144 = vmatmul.mubr.bf16.vlgmr.msra.gmra.mrb[8].mxu0 %v808_v14 }
 0x34b   :  { %v914_v16 = vpop.f32.mrb[8].mxu0 }
 0x34c   :  { %v915_v17 = vadd.f32 %v1006_v15, %v914_v16  ;;  %v1145_v18 = vpop.f32.mrb[9].mxu0 }
 0x34d   :  { %v917_v19 = vpop.f32.mrb[10].mxu0 }
 0x34e   :  { %921 = vst [vmem:[#allocation10] sm:$0xff] %v915_v17  ;;  %v918_v20 = vadd.f32 %v1006_v15, %v917_v19  ;;  %v1146_v21 = vpop.f32.mrb[11].mxu0 }
 0x350   :  { %922 = vst [vmem:[#allocation10 + $0x8] sm:$0xff] %v918_v20 }
 0x351   :  { %1340 = shalt.err (!%p1337_p8)
}
 0x352   :  { %s1341_s10 = scalar_lea.hbm %s1527_s7, 256 }
 0x353   :  { %p1342_p9 = scmp.ne.s32.totalorder %s1527_s7, %s1341_s10  ;;  %p1345_p10 = scmp.lt.u32.totalorder %s1341_s10, %s1527_s7 }
 0x355   :  { %p1347_p11 = pnand %p1345_p10, %p1342_p9 }
 0x357   :  { %1350 = shalt.err (!%p1347_p11)
}
 0x358   :  { %s1370_s18 = smov 128   ;;  %s1371_s0 = smov 8  }
 0x359   :  { %934 = dma.vmem_to_hbm [thread:$0]  %s929_s30, 256, %s1527_s7, [#allocation4], %s1370_s18, %s1370_s18, %s1371_s0  }
 0x35a   :  { %1357 = dma.done.wait [#allocation4], 256  }
 0x35b   :  { %1358 = vsyncadd [#allocation4], 4294967040 }
 0x35c   :  { %938 = vsyncpa [#allocation3], 1 }
 0x35d   :  { %939 = vsyncpa [#allocation6], 1 }
 0x35e   :  { %940 = vsyncpa [#allocation9], 1 }
 0x35f   :  { %941 = vsyncpa [#allocation4], 1 }

// kernel: tpu_custom_call.1
= control target key start
LH: loop header
LB: loop body
LE: loop exit
PB: predicated region body
PF: predicated region fallthrough
CT: control target
= control target key end

     0   :  { %12 = vsyncpa [#allocation3], 0  ;;  %s1520_s0 = inlined_call_operand.hbm [shape: f32[16,784], index: 0, kind: input, shape index: {}]   ;;  %s1521_s1 = inlined_call_operand.hbm [shape: bf16[784,128], index: 1, kind: input, shape index: {}]   ;;  %s1522_s2 = inlined_call_operand.vmem [shape: f32[1,128], index: 2, kind: input, shape index: {}]   ;;  %s1523_s3 = inlined_call_operand.hbm [shape: bf16[128,128], index: 3, kind: input, shape index: {}]   ;;  %s1524_s4 = inlined_call_operand.vmem [shape: f32[1,128], index: 4, kind: input, shape index: {}]   ;;  %s1525_s5 = inlined_call_operand.hbm [shape: bf16[128,128], index: 5, kind: input, shape index: {}]   ;;  %s1526_s6 = inlined_call_operand.vmem [shape: f32[1,128], index: 6, kind: input, shape index: {}]   ;;  %s1527_s7 = inlined_call_operand.hbm [shape: f32[16,128], index: 7, kind: output, shape index: {}]  }
   0x1   :  { %13 = vsyncpa [#allocation6], 0 }
   0x2   :  { %14 = vsyncpa [#allocation9], 0 }
   0x3   :  { %15 = vsyncpa [#allocation4], 0  ;;  %s1359_s24 = smov [#allocation5]   ;;  %s1241_s28 = scalar_lea.hbm %s1521_s1, 6272 }
   0x4   :  { %s33_s25 = sshll.u32 %s1359_s24, 4  ;;  %p1242_p0 = scmp.ne.s32.totalorder %s1521_s1, %s1241_s28  ;;  %s34_s25 = int_to_ptr.vmem [resolvable:$true] %s33_s25 }
   0x5   :  { %p1245_p1 = scmp.lt.u32.totalorder %s1241_s28, %s1521_s1 }
   0x7   :  { %p1247_p2 = pnand %p1245_p1, %p1242_p0 }
   0x9   :  { %1250 = shalt.err (!%p1247_p2)
}
   0xa   :  { %s1251_s10 = scalar_lea.vmem %s34_s25, 6272  ;;  %p1256_p4 = scmp.lt.s32.totalorder %s34_s25, %s34_s25 }
   0xb   :  { %p1252_p3 = scmp.ne.s32.totalorder %s34_s25, %s1251_s10  ;;  %p1257_p5 = scmp.lt.s32.totalorder %s1251_s10, %s1251_s10 }
   0xd   :  { %p1258_p6 = por %p1257_p5, %p1256_p4 }
   0xf   :  { %p1259_p7 = pnand %p1258_p6, %p1252_p3 }
  0x11   :  { %1262 = shalt.err (!%p1259_p7)
}
  0x12   :  { %s1360_s11 = smov 64   ;;  %s1361_s12 = smov 4  }
  0x13   :  { %39 = dma.hbm_to_vmem [thread:$0]  %s1521_s1, 6272, %s34_s25, [#allocation6], %s1360_s11, %s1360_s11, %s1361_s12  }
  0x14   :  { %s1362_s15 = smov [#allocation2]   ;;  %s1263_s19 = scalar_lea.hbm %s1520_s0, 1792 }
  0x15   :  { %s21_s16 = sshll.u32 %s1362_s15, 4  ;;  %p1264_p8 = scmp.ne.s32.totalorder %s1520_s0, %s1263_s19  ;;  %s22_s16 = int_to_ptr.vmem [resolvable:$true] %s21_s16 }
  0x16   :  { %p1267_p9 = scmp.lt.u32.totalorder %s1263_s19, %s1520_s0 }
  0x18   :  { %p1269_p10 = pnand %p1267_p9, %p1264_p8 }
  0x1a   :  { %1272 = shalt.err (!%p1269_p10)
}
  0x1b   :  { %s1273_s24 = scalar_lea.vmem %s22_s16, 1792  ;;  %p1278_p12 = scmp.lt.s32.totalorder %s22_s16, %s22_s16 }
  0x1c   :  { %p1274_p11 = scmp.ne.s32.totalorder %s22_s16, %s1273_s24  ;;  %p1279_p13 = scmp.lt.s32.totalorder %s1273_s24, %s1273_s24 }
  0x1e   :  { %p1280_p0 = por %p1279_p13, %p1278_p12 }
  0x20   :  { %p1281_p1 = pnand %p1280_p0, %p1274_p11 }
  0x22   :  { %1284 = shalt.err (!%p1281_p1)
}
  0x23   :  { %s1363_s1 = smov 896   ;;  %s1364_s25 = smov 56  }
  0x24   :  { %27 = dma.hbm_to_vmem [thread:$0]  %s1520_s0, 1792, %s22_s16, [#allocation3], %s1363_s1, %s1363_s1, %s1364_s25  }
  0x25   :  { %s1365_s28 = smov [#allocation7]   ;;  %s1366_s30 = smov [#allocation8]  }
  0x26   :  { %s47_s29 = sshll.u32 %s1365_s28, 4  ;;  %s61_s8 = sshll.u32 %s1366_s30, 4  ;;  %s48_s29 = int_to_ptr.vmem [resolvable:$true] %s47_s29  ;;  %s1439_s8 = int_to_ptr.vmem [resolvable:$true] %s61_s8 }
  0x27   :  { %s1285_s13 = scalar_lea.hbm %s1523_s3, 1024 }
  0x28   :  { %p1286_p2 = scmp.ne.s32.totalorder %s1523_s3, %s1285_s13  ;;  %p1289_p3 = scmp.lt.u32.totalorder %s1285_s13, %s1523_s3 }
  0x2a   :  { %p1291_p4 = pnand %p1289_p3, %p1286_p2 }
  0x2c   :  { %1294 = shalt.err (!%p1291_p4)
}
  0x2d   :  { %s1295_s0 = scalar_lea.vmem %s48_s29, 1024  ;;  %p1300_p6 = scmp.lt.s32.totalorder %s48_s29, %s48_s29 }
  0x2e   :  { %p1296_p5 = scmp.ne.s32.totalorder %s48_s29, %s1295_s0  ;;  %p1301_p7 = scmp.lt.s32.totalorder %s1295_s0, %s1295_s0 }
  0x30   :  { %p1302_p8 = por %p1301_p7, %p1300_p6 }
  0x32   :  { %p1303_p9 = pnand %p1302_p8, %p1296_p5 }
  0x34   :  { %1306 = shalt.err (!%p1303_p9)
}
  0x35   :  { %53 = dma.hbm_to_vmem [thread:$0]  %s1523_s3, 1024, %s48_s29, [#allocation6], %s1360_s11, %s1360_s11, %s1361_s12  }
  0x36   :  { %s1307_s22 = scalar_lea.hbm %s1525_s5, 1024 }
  0x37   :  { %p1308_p10 = scmp.ne.s32.totalorder %s1525_s5, %s1307_s22  ;;  %p1311_p11 = scmp.lt.u32.totalorder %s1307_s22, %s1525_s5 }
  0x39   :  { %p1313_p12 = pnand %p1311_p11, %p1308_p10 }
  0x3b   :  { %1316 = shalt.err (!%p1313_p12)
}
  0x3c   :  { %s1317_s26 = scalar_lea.vmem %s1439_s8, 1024  ;;  %p1322_p0 = scmp.lt.s32.totalorder %s1439_s8, %s1439_s8 }
  0x3d   :  { %p1318_p13 = scmp.ne.s32.totalorder %s1439_s8, %s1317_s26  ;;  %p1323_p1 = scmp.lt.s32.totalorder %s1317_s26, %s1317_s26 }
  0x3f   :  { %p1324_p2 = por %p1323_p1, %p1322_p0 }
  0x41   :  { %p1325_p3 = pnand %p1324_p2, %p1318_p13 }
  0x43   :  { %1328 = shalt.err (!%p1325_p3)
}
  0x44   :  { %67 = dma.hbm_to_vmem [thread:$0]  %s1525_s5, 1024, %s1439_s8, [#allocation9], %s1360_s11, %s1360_s11, %s1361_s12  }
  0x45   :  { %1351 = dma.done.wait [#allocation3], 1792  }
  0x46   :  { %1352 = vsyncadd [#allocation3], 4294965504 }
  0x47   :  { %1353 = dma.done.wait [#allocation6], 7296  }
  0x48   :  { %1354 = vsyncadd [#allocation6], 4294960000 }
  0x49   :  { %1355 = dma.done.wait [#allocation9], 1024  }
  0x4a   :  { %1356 = vsyncadd [#allocation9], 4294966272  ;;  %v1160_v0 = vld [vmem:[#allocation5 + $0x40] sm:$0xff]   ;;  %v1164_v4 = vld [vmem:[#allocation5 + $0x48] sm:$0xff]   ;;  %v1367_v43 = vmov 0.0   ;;  %vm1368_vm0 = vmmov 0  }
  0x4b   :  { %v1161_v1 = vld [vmem:[#allocation5] sm:$0xff]   ;;  %1015 = vmatprep.subr.bf16.mxu0 %v1160_v0  ;;  %v1165_v5 = vld [vmem:[#allocation5 + $0x8] sm:$0xff]   ;;  %v1168_v8 = vld [vmem:[#allocation5 + $0x50] sm:$0xff]   ;;  %vm503_vm1 = vcmask 130048   ;;  %s1369_s29 = smov [#allocation10]  }
  0x4c   :  { %v1162_v2 = vld [vmem:[#allocation5 + $0xc0] sm:$0xff]   ;;  %1016 = vmatpush3.bf16.msra.mxu0 %v1161_v1  ;;  %v1166_v6 = vld [vmem:[#allocation5 + $0xc8] sm:$0xff]   ;;  %v1169_v9 = vld [vmem:[#allocation5 + $0x10] sm:$0xff]   ;;  %s928_s30 = sshll.u32 %s1369_s29, 4  ;;  %s929_s30 = int_to_ptr.vmem [resolvable:$true] %s928_s30 }
  0x4d   :  { %v1163_v3 = vld [vmem:[#allocation5 + $0x80] sm:$0xff]   ;;  %1037 = vmatprep.subr.bf16.mxu1 %v1162_v2  ;;  %1017 = vmatprep.subr.bf16.mxu0 %v1164_v4  ;;  %v1167_v7 = vld [vmem:[#allocation5 + $0x88] sm:$0xff]   ;;  %v1170_v10 = vld [vmem:[#allocation5 + $0xd0] sm:$0xff]   ;;  %s1329_s8 = scalar_lea.vmem %s929_s30, 256  ;;  %p1334_p5 = scmp.lt.s32.totalorder %s929_s30, %s929_s30 }
  0x4e   :  { %1038 = vmatpush3.bf16.msra.mxu1 %v1163_v3  ;;  %v1171_v11 = vld [vmem:[#allocation5 + $0x90] sm:$0xff]   ;;  %v1172_v12 = vld [vmem:[#allocation5 + $0x58] sm:$0xff]   ;;  %v1176_v16 = vld [vmem:[#allocation5 + $0x60] sm:$0xff]   ;;  %p1330_p4 = scmp.ne.s32.totalorder %s929_s30, %s1329_s8  ;;  %p1335_p6 = scmp.lt.s32.totalorder %s1329_s8, %s1329_s8 }
  0x4f   :  { %1039 = vmatprep.subr.bf16.mxu1 %v1166_v6  ;;  %v1173_v13 = vld [vmem:[#allocation5 + $0x18] sm:$0xff]   ;;  %v1177_v17 = vld [vmem:[#allocation5 + $0x20] sm:$0xff]   ;;  %v1180_v20 = vld [vmem:[#allocation5 + $0x68] sm:$0xff]  }
  0x50   :  { %1018 = vmatpush3.bf16.msra.mxu0 %v1165_v5  ;;  %v1174_v14 = vld [vmem:[#allocation5 + $0xd8] sm:$0xff]   ;;  %v1178_v18 = vld [vmem:[#allocation5 + $0xe0] sm:$0xff]   ;;  %v1181_v21 = vld [vmem:[#allocation5 + $0x28] sm:$0xff]   ;;  %p1336_p7 = por %p1335_p6, %p1334_p5 }
  0x51   :  { %1019 = vmatprep.subr.bf16.mxu0 %v1168_v8  ;;  %v1175_v15 = vld [vmem:[#allocation5 + $0x98] sm:$0xff]   ;;  %v1179_v19 = vld [vmem:[#allocation5 + $0xa0] sm:$0xff]   ;;  %v1182_v22 = vld [vmem:[#allocation5 + $0xe8] sm:$0xff]  }
  0x52   :  { %1040 = vmatpush3.bf16.msra.mxu1 %v1167_v7  ;;  %v1183_v23 = vld [vmem:[#allocation5 + $0xa8] sm:$0xff]   ;;  %v1184_v24 = vld [vmem:[#allocation5 + $0x70] sm:$0xff]   ;;  %v1188_v28 = vld [vmem:[#allocation5 + $0x78] sm:$0xff]   ;;  %p1337_p8 = pnand %p1336_p7, %p1330_p4 }
  0x53   :  { %1041 = vmatprep.subr.bf16.mxu1 %v1170_v10  ;;  %v1185_v25 = vld [vmem:[#allocation5 + $0x30] sm:$0xff]   ;;  %v1189_v29 = vld [vmem:[#allocation5 + $0x38] sm:$0xff]   ;;  %v90_v36 = vld [vmem:[#allocation2 + $0x38] sm:$0xff] }
  0x54   :  { %1020 = vmatpush3.bf16.msra.mxu0 %v1169_v9  ;;  %v1186_v26 = vld [vmem:[#allocation5 + $0xf0] sm:$0xff]   ;;  %v1190_v30 = vld [vmem:[#allocation5 + $0xf8] sm:$0xff]   ;;  %v1192_v38 = vld [vmem:[#allocation5 + $0x140] sm:$0xff]  }
  0x55   :  { %1021 = vmatprep.subr.bf16.mxu0 %v1172_v12  ;;  %v1187_v27 = vld [vmem:[#allocation5 + $0xb0] sm:$0xff]   ;;  %v84_v31 = vld [vmem:[#allocation2 + $0x8] sm:$0xff]  ;;  %v86_v39 = vld [vmem:[#allocation2 + $0x18] sm:$0xff] }
  0x56   :  { %1042 = vmatpush3.bf16.msra.mxu1 %v1171_v11  ;;  %v91_v32 = vld [vmem:[#allocation2 + $0x40] sm:$0xff]  ;;  %v1191_v34 = vld [vmem:[#allocation5 + $0xb8] sm:$0xff]   ;;  %v93_v40 = vld [vmem:[#allocation2 + $0x50] sm:$0xff] }
  0x57   :  { %1043 = vmatprep.subr.bf16.mxu1 %v1174_v14  ;;  %v98_v33 = vpack.c.bf16 %v91_v32, %v84_v31  ;;  %v83_v35 = vld [vmem:[#allocation2] sm:$0xff]  ;;  %v100_v41 = vpack.c.bf16 %v93_v40, %v86_v39  ;;  %v1193_v42 = vld [vmem:[#allocation5 + $0x100] sm:$0xff]   ;;  %v92_v45 = vld [vmem:[#allocation2 + $0x48] sm:$0xff] }
  0x58   :  { %1022 = vmatpush3.bf16.msra.mxu0 %v1173_v13  ;;  %v97_v37 = vpack.c.bf16 %v90_v36, %v83_v35  ;;  %v85_v44 = vld [vmem:[#allocation2 + $0x10] sm:$0xff]  ;;  %v1194_v47 = vld [vmem:[#allocation5 + $0x148] sm:$0xff]   ;;  %v1196_v49 = vld [vmem:[#allocation5 + $0x150] sm:$0xff]  }
  0x59   :  { %1023 = vmatprep.subr.bf16.mxu0 %v1176_v16  ;;  %539 = vmatprep.mubr.bf16.mxu0 %v98_v33  ;;  %v99_v46 = vpack.c.bf16 %v92_v45, %v85_v44  ;;  %v1195_v48 = vld [vmem:[#allocation5 + $0x108] sm:$0xff]   ;;  %v1197_v50 = vld [vmem:[#allocation5 + $0x110] sm:$0xff]   ;;  %v1198_v51 = vld [vmem:[#allocation5 + $0x158] sm:$0xff]  }
  0x5a   :  { %1044 = vmatpush3.bf16.msra.mxu1 %v1175_v15  ;;  %580 = vmatprep.mubr.bf16.mxu1 %v100_v41  ;;  %v1199_v52 = vld [vmem:[#allocation5 + $0x118] sm:$0xff]   ;;  %v1200_v53 = vld [vmem:[#allocation5 + $0x160] sm:$0xff]   ;;  %v1202_v55 = vld [vmem:[#allocation5 + $0x168] sm:$0xff]  }
  0x5b   :  { %1045 = vmatprep.subr.bf16.mxu1 %v1178_v18  ;;  %v1201_v54 = vld [vmem:[#allocation5 + $0x120] sm:$0xff]   ;;  %v88_v57 = vld [vmem:[#allocation2 + $0x28] sm:$0xff]  ;;  %v1203_v58 = vld [vmem:[#allocation5 + $0x128] sm:$0xff]  }
  0x5c   :  { %1024 = vmatpush3.bf16.msra.mxu0 %v1177_v17  ;;  %v1208_v56 = vld [vmem:[#allocation5 + $0x180] sm:$0xff]   ;;  %v1204_v59 = vld [vmem:[#allocation5 + $0x170] sm:$0xff]   ;;  %v96_v63 = vld [vmem:[#allocation2 + $0x68] sm:$0xff] }
  0x5d   :  { %1025 = vmatprep.subr.bf16.mxu0 %v1180_v20  ;;  %v95_v60 = vld [vmem:[#allocation2 + $0x60] sm:$0xff]  ;;  %v89_v62 = vld [vmem:[#allocation2 + $0x30] sm:$0xff]  ;;  %v1206_v2 = vld [vmem:[#allocation5 + $0x178] sm:$0xff]  }
  0x5e   :  { %1046 = vmatpush3.bf16.msra.mxu1 %v1179_v19  ;;  %v102_v61 = vpack.c.bf16 %v95_v60, %v88_v57  ;;  %v103_v0 = vpack.c.bf16 %v96_v63, %v89_v62  ;;  %v1205_v1 = vld [vmem:[#allocation5 + $0x130] sm:$0xff]   ;;  %v1207_v3 = vld [vmem:[#allocation5 + $0x138] sm:$0xff]   ;;  %v94_v5 = vld [vmem:[#allocation2 + $0x58] sm:$0xff] }
  0x5f   :  { %1047 = vmatprep.subr.bf16.mxu1 %v1182_v22  ;;  %v87_v4 = vld [vmem:[#allocation2 + $0x20] sm:$0xff]  ;;  %v1209_v7 = vld [vmem:[#allocation7] sm:$0xff]   ;;  %v1211_v9 = vld [vmem:[#allocation7 + $0x10] sm:$0xff]  }
  0x60   :  { %1026 = vmatpush3.bf16.msra.mxu0 %v1181_v21  ;;  %v101_v6 = vpack.c.bf16 %v94_v5, %v87_v4  ;;  %v1210_v8 = vld [vmem:[#allocation7 + $0x8] sm:$0xff]   ;;  %v1212_v10 = vld [vmem:[#allocation7 + $0x18] sm:$0xff]   ;;  %v1213_v11 = vld [vmem:[#allocation7 + $0x20] sm:$0xff]  }
  0x61   :  { %1027 = vmatprep.subr.bf16.mxu0 %v1184_v24  ;;  %v1214_v12 = vld [vmem:[#allocation7 + $0x28] sm:$0xff]   ;;  %v1215_v13 = vld [vmem:[#allocation7 + $0x30] sm:$0xff]   ;;  %v1216_v14 = vld [vmem:[#allocation7 + $0x38] sm:$0xff]  }
  0x62   :  { %1048 = vmatpush3.bf16.msra.mxu1 %v1183_v23  ;;  %v942_v16 = vld [vmem:[%s1522_s2] ss:$0 sm:$0xff]  ;;  %v1221_v60 = vld [vmem:[#allocation8 + $0x20] sm:$0xff]   ;;  %v1223_v62 = vld [vmem:[#allocation8 + $0x30] sm:$0xff]  }
  0x63   :  { %1049 = vmatprep.subr.bf16.mxu1 %v1186_v26  ;;  %v1218_v57 = vld [vmem:[#allocation8 + $0x8] sm:$0xff]   ;;  %v1224_v63 = vld [vmem:[#allocation8 + $0x38] sm:$0xff]  }
  0x64   :  { %1028 = vmatpush3.bf16.msra.mxu0 %v1185_v25 }
  0x65   :  { %1029 = vmatprep.subr.bf16.mxu0 %v1188_v28 }
  0x66   :  { %1050 = vmatpush3.bf16.msra.mxu1 %v1187_v27 }
  0x67   :  { %1051 = vmatprep.subr.bf16.mxu1 %v1190_v30 }
  0x68   :  { %1030 = vmatpush3.bf16.msra.mxu0 %v1189_v29 }
  0x69   :  { %1059 = vmatprep.subr.bf16.mxu0 %v1192_v38 }
  0x6a   :  { %1052 = vmatpush3.bf16.msra.mxu1 %v1191_v34 }
  0x6b   :  { %1101 = vmatprep.subr.bf16.mxu1 %v1367_v43  ;;  %540 = vmatmul.mubr.bf16.vlgmr.msra.gmra.mrb[0].mxu0 %v97_v37 }
  0x6c   :  { %1060 = vmatpush3.bf16.msra.mxu0 %v1193_v42  ;;  %621 = vmatprep.mubr.bf16.mxu0 %v102_v61  ;;  %v1222_v61 = vld [vmem:[#allocation8 + $0x28] sm:$0xff]  }
  0x6d   :  { %581 = vmatmul.mubr.bf16.vlgmr.msra.gmra.mrb[0].mxu1 %v99_v46  ;;  %1061 = vmatprep.subr.bf16.mxu0 %v1194_v47 }
  0x6e   :  { %1103 = vmatprep.mubr.msk.bf16.mxu1 %vm1368_vm0, %v1367_v43  ;;  %1102 = vmatpush3.bf16.msra.mxu1 %v1208_v56  ;;  %v1217_v56 = vld [vmem:[#allocation8] sm:$0xff]  }
  0x6f   :  { %1107 = vmatprep.subr.bf16.mxu1 %v1367_v43 }
  0x70   :  { %1062 = vmatpush3.bf16.msra.mxu0 %v1195_v48 }
  0x71   :  { %1063 = vmatprep.subr.bf16.mxu0 %v1196_v49 }
  0x74   :  { %1064 = vmatpush3.bf16.msra.mxu0 %v1197_v50 }
  0x75   :  { %1065 = vmatprep.subr.bf16.mxu0 %v1198_v51  ;;  %1104 = vmatmul.mubr.msk.bf16.vlgmr.msra.gmra.mrb[4].mxu1 %vm503_vm1, %v103_v0  ;;  %v995_v0 = vld [vmem:[%s1524_s4] ss:$0 sm:$0xff] }
  0x76   :  { %1123 = vmatprep.mubr.msk.bf16.mxu1 %vm1368_vm0, %v1367_v43  ;;  %1108 = vmatpush3.bf16.msra.mxu1 %v1209_v7 }
  0x77   :  { %1109 = vmatprep.subr.bf16.mxu1 %v1367_v43 }
  0x78   :  { %1066 = vmatpush3.bf16.msra.mxu0 %v1199_v52 }
  0x79   :  { %1067 = vmatprep.subr.bf16.mxu0 %v1200_v53 }
  0x7a   :  { %1110 = vmatpush3.bf16.msra.mxu1 %v1210_v8 }
  0x7b   :  { %1111 = vmatprep.subr.bf16.mxu1 %v1367_v43 }
  0x7c   :  { %1068 = vmatpush3.bf16.msra.mxu0 %v1201_v54 }
  0x7d   :  { %1069 = vmatprep.subr.bf16.mxu0 %v1202_v55 }
  0x7e   :  { %1112 = vmatpush3.bf16.msra.mxu1 %v1211_v9 }
  0x7f   :  { %1113 = vmatprep.subr.bf16.mxu1 %v1367_v43 }
  0x80   :  { %1070 = vmatpush3.bf16.msra.mxu0 %v1203_v58  ;;  %v1219_v58 = vld [vmem:[#allocation8 + $0x10] sm:$0xff]  }
  0x81   :  { %1071 = vmatprep.subr.bf16.mxu0 %v1204_v59  ;;  %v1220_v59 = vld [vmem:[#allocation8 + $0x18] sm:$0xff]  }
  0x82   :  { %1114 = vmatpush3.bf16.msra.mxu1 %v1212_v10 }
  0x83   :  { %1115 = vmatprep.subr.bf16.mxu1 %v1367_v43 }
  0x84   :  { %1072 = vmatpush3.bf16.msra.mxu0 %v1205_v1 }
  0x85   :  { %1073 = vmatprep.subr.bf16.mxu0 %v1206_v2 }
  0x86   :  { %1116 = vmatpush3.bf16.msra.mxu1 %v1213_v11 }
  0x87   :  { %1117 = vmatprep.subr.bf16.mxu1 %v1367_v43 }
  0x88   :  { %1074 = vmatpush3.bf16.msra.mxu0 %v1207_v3 }
  0x89   :  { %1127 = vmatprep.subr.bf16.mxu0 %v1367_v43 }
  0x8a   :  { %1118 = vmatpush3.bf16.msra.mxu1 %v1214_v12 }
  0x8b   :  { %622 = vmatmul.mubr.bf16.vlgmr.msra.gmra.mrb[4].mxu0 %v101_v6  ;;  %1119 = vmatprep.subr.bf16.mxu1 %v1367_v43 }
  0x8c   :  { %1143 = vmatprep.mubr.msk.bf16.mxu0 %vm1368_vm0, %v1367_v43  ;;  %1128 = vmatpush3.bf16.msra.mxu0 %v1217_v56 }
  0x8d   :  { %1129 = vmatprep.subr.bf16.mxu0 %v1367_v43 }
  0x8e   :  { %1120 = vmatpush3.bf16.msra.mxu1 %v1215_v13 }
  0x8f   :  { %1121 = vmatprep.subr.bf16.mxu1 %v1367_v43 }
  0x90   :  { %1130 = vmatpush3.bf16.msra.mxu0 %v1218_v57 }
  0x91   :  { %1131 = vmatprep.subr.bf16.mxu0 %v1367_v43 }
  0x92   :  { %1122 = vmatpush3.bf16.msra.mxu1 %v1216_v14 }
  0x94   :  { %1132 = vmatpush3.bf16.msra.mxu0 %v1219_v58 }
  0x95   :  { %1133 = vmatprep.subr.bf16.mxu0 %v1367_v43 }
  0x98   :  { %1134 = vmatpush3.bf16.msra.mxu0 %v1220_v59 }
  0x99   :  { %1135 = vmatprep.subr.bf16.mxu0 %v1367_v43 }
  0x9c   :  { %1136 = vmatpush3.bf16.msra.mxu0 %v1221_v60 }
  0x9d   :  { %1137 = vmatprep.subr.bf16.mxu0 %v1367_v43 }
  0xa0   :  { %1138 = vmatpush3.bf16.msra.mxu0 %v1222_v61 }
  0xa1   :  { %1139 = vmatprep.subr.bf16.mxu0 %v1367_v43 }
  0xa4   :  { %1140 = vmatpush3.bf16.msra.mxu0 %v1223_v62 }
  0xa5   :  { %1141 = vmatprep.subr.bf16.mxu0 %v1367_v43 }
  0xa8   :  { %1142 = vmatpush3.bf16.msra.mxu0 %v1224_v63 }
 0x13e   :  { %v1031_v15 = vpop.f32.mrb[0].mxu0 }
 0x13f   :  { %v1032_v17 = vpop.f32.mrb[1].mxu0 }
 0x140   :  { %v1033_v18 = vadd.f32 %v1032_v17, %v1031_v15  ;;  %v1034_v19 = vpop.f32.mrb[2].mxu0  ;;  %v1053_v20 = vpop.f32.mrb[0].mxu1  ;;  %v1006_v15 = vld [vmem:[%s1526_s6] ss:$0 sm:$0xff] }
 0x141   :  { %v1035_v21 = vpop.f32.mrb[3].mxu0  ;;  %v1054_v24 = vpop.f32.mrb[1].mxu1 }
 0x142   :  { %v542_v22 = vadd.f32 %v1033_v18, %v942_v16  ;;  %v1036_v23 = vadd.f32 %v1035_v21, %v1034_v19  ;;  %v1055_v25 = vadd.f32 %v1054_v24, %v1053_v20  ;;  %v1056_v26 = vpop.f32.mrb[2].mxu1 }
 0x143   :  { %v1057_v28 = vpop.f32.mrb[3].mxu1 }
 0x144   :  { %v545_v27 = vadd.f32 %v1036_v23, %v942_v16  ;;  %v583_v29 = vadd.f32 %v1055_v25, %v542_v22  ;;  %v1058_v30 = vadd.f32 %v1057_v28, %v1056_v26 }
 0x146   :  { %v586_v31 = vadd.f32 %v1058_v30, %v545_v27 }
 0x148   :  { %v664_v32 = vpop.f32.mrb[4].mxu1 }
 0x149   :  { %v1105_v33 = vpop.f32.mrb[5].mxu1 }
 0x14a   :  { %v667_v34 = vpop.f32.mrb[6].mxu1 }
 0x14b   :  { %v1106_v35 = vpop.f32.mrb[7].mxu1 }
 0x15e   :  { %v1075_v36 = vpop.f32.mrb[4].mxu0 }
 0x15f   :  { %v1076_v37 = vpop.f32.mrb[5].mxu0 }
 0x160   :  { %v1077_v38 = vadd.f32 %v1076_v37, %v1075_v36  ;;  %v1078_v39 = vpop.f32.mrb[6].mxu0 }
 0x161   :  { %v1079_v40 = vpop.f32.mrb[7].mxu0 }
 0x162   :  { %v624_v41 = vadd.f32 %v1077_v38, %v583_v29  ;;  %v1080_v42 = vadd.f32 %v1079_v40, %v1078_v39 }
 0x164   :  { %v665_v44 = vadd.f32 %v664_v32, %v624_v41  ;;  %v627_v45 = vadd.f32 %v1080_v42, %v586_v31 }
 0x166   :  { %v993_v46 = vmul.f32 -1.442695, %v665_v44  ;;  %v668_v47 = vadd.f32 %v667_v34, %v627_v45 }
 0x168   :  { %1225 = vpow2.f32 %v993_v46  ;;  %v994_v48 = vmul.f32 -1.442695, %v668_v47 }
 0x16a   :  { %1227 = vpow2.f32 %v994_v48 }
 0x172   :  { %v1226_v49 = vpop.eup %1225 }
 0x173   :  { %v677_v50 = vadd.f32 1.0, %v1226_v49 }
 0x174   :  { %v1228_v51 = vpop.eup %1227 }
 0x175   :  { %v678_v52 = vadd.f32 1.0, %v1228_v51  ;;  %1229 = vrcp.f32 %v677_v50 }
 0x177   :  { %1231 = vrcp.f32 %v678_v52 }
 0x17f   :  { %v1230_v53 = vpop.eup %1229 }
 0x181   :  { %v1232_v54 = vpop.eup %1231 }
 0x182   :  { %v683_v55 = vpack.c.bf16 %v1232_v54, %v1230_v53 }
 0x184   :  { %1124 = vmatmul.mubr.bf16.vlgmr.msra.gmra.mrb[8].mxu1 %v683_v55 }
 0x257   :  { %v789_v1 = vpop.f32.mrb[8].mxu1 }
 0x258   :  { %v790_v2 = vadd.f32 %v995_v0, %v789_v1  ;;  %v1125_v3 = vpop.f32.mrb[9].mxu1 }
 0x259   :  { %v792_v4 = vpop.f32.mrb[10].mxu1 }
 0x25a   :  { %v1004_v5 = vmul.f32 -1.442695, %v790_v2  ;;  %v793_v6 = vadd.f32 %v995_v0, %v792_v4  ;;  %v1126_v7 = vpop.f32.mrb[11].mxu1 }
 0x25c   :  { %1233 = vpow2.f32 %v1004_v5  ;;  %v1005_v8 = vmul.f32 -1.442695, %v793_v6 }
 0x25e   :  { %1235 = vpow2.f32 %v1005_v8 }
 0x266   :  { %v1234_v9 = vpop.eup %1233 }
 0x267   :  { %v802_v10 = vadd.f32 1.0, %v1234_v9 }
 0x268   :  { %v1236_v11 = vpop.eup %1235 }
 0x269   :  { %v803_v12 = vadd.f32 1.0, %v1236_v11  ;;  %1237 = vrcp.f32 %v802_v10 }
 0x26b   :  { %1239 = vrcp.f32 %v803_v12 }
 0x273   :  { %v1238_v43 = vpop.eup %1237 }
 0x275   :  { %v1240_v13 = vpop.eup %1239 }
 0x276   :  { %v808_v14 = vpack.c.bf16 %v1240_v13, %v1238_v43 }
 0x278   :  { %1144 = vmatmul.mubr.bf16.vlgmr.msra.gmra.mrb[8].mxu0 %v808_v14 }
 0x34b   :  { %v914_v16 = vpop.f32.mrb[8].mxu0 }
 0x34c   :  { %v915_v17 = vadd.f32 %v1006_v15, %v914_v16  ;;  %v1145_v18 = vpop.f32.mrb[9].mxu0 }
 0x34d   :  { %v917_v19 = vpop.f32.mrb[10].mxu0 }
 0x34e   :  { %921 = vst [vmem:[#allocation10] sm:$0xff] %v915_v17  ;;  %v918_v20 = vadd.f32 %v1006_v15, %v917_v19  ;;  %v1146_v21 = vpop.f32.mrb[11].mxu0 }
 0x350   :  { %922 = vst [vmem:[#allocation10 + $0x8] sm:$0xff] %v918_v20 }
 0x351   :  { %1340 = shalt.err (!%p1337_p8)
}
 0x352   :  { %s1341_s10 = scalar_lea.hbm %s1527_s7, 256 }
 0x353   :  { %p1342_p9 = scmp.ne.s32.totalorder %s1527_s7, %s1341_s10  ;;  %p1345_p10 = scmp.lt.u32.totalorder %s1341_s10, %s1527_s7 }
 0x355   :  { %p1347_p11 = pnand %p1345_p10, %p1342_p9 }
 0x357   :  { %1350 = shalt.err (!%p1347_p11)
}
 0x358   :  { %s1370_s18 = smov 128   ;;  %s1371_s0 = smov 8  }
 0x359   :  { %934 = dma.vmem_to_hbm [thread:$0]  %s929_s30, 256, %s1527_s7, [#allocation4], %s1370_s18, %s1370_s18, %s1371_s0  }
 0x35a   :  { %1357 = dma.done.wait [#allocation4], 256  }
 0x35b   :  { %1358 = vsyncadd [#allocation4], 4294967040 }
 0x35c   :  { %938 = vsyncpa [#allocation3], 1 }
 0x35d   :  { %939 = vsyncpa [#allocation6], 1 }
 0x35e   :  { %940 = vsyncpa [#allocation9], 1 }
 0x35f   :  { %941 = vsyncpa [#allocation4], 1 }

</bundles_post_ra>
